<compile_context>
chip_gen: v7x
topology: tpu7x:2x2x1
jax: 0.10.0
libtpu: 0.0.40
codegen_flags: <defaults>
</compile_context>

<pallas_src>
import jax
import jax.numpy as jnp
from jax.experimental import pallas as pl
from jax.experimental.pallas import tpu as pltpu

LANE = 128      # lane width: last-dim granularity (MXU N/K, dense stores)
SUBLANE = 8     # sublane granularity: second-to-last dim


def _round_up(x, m):
    return (x + m - 1) // m * m


# --------------------------------------------------------------------------
# Kernel: one batch tile through the whole 3-layer MLP.
# --------------------------------------------------------------------------
def generator_kernel(z_ref, w1_ref, b1_ref, w2_ref, b2_ref, w3_ref, b3_ref,
                     out_ref):
    # Layer 1: MXU (bf16 x bf16 -> f32) + fused f32 bias/ReLU/bf16-cast epilogue.
    h1 = jnp.maximum(
        jnp.dot(z_ref[...], w1_ref[...], preferred_element_type=jnp.float32)
        + b1_ref[...], 0.0).astype(jnp.bfloat16)
    # Layer 2.
    h2 = jnp.maximum(
        jnp.dot(h1, w2_ref[...], preferred_element_type=jnp.float32)
        + b2_ref[...], 0.0).astype(jnp.bfloat16)
    # Layer 3 + Tanh (EUP transcendental).
    h3 = jnp.dot(h2, w3_ref[...], preferred_element_type=jnp.float32) + b3_ref[...]
    out_ref[...] = jnp.tanh(h3).astype(out_ref.dtype)


# --------------------------------------------------------------------------
# One-time parameter preparation (hoisted out of the per-forward path).
# --------------------------------------------------------------------------
def prepare_generator_params(params):
    """Pad feature dims to lane multiples and cast for the kernel.

    Call ONCE (outside the generation / training loop) and reuse the result:
    it is a full HBM pass over every parameter and must not sit on the
    per-forward path. Accepts biases of shape (fan_out,) or (1, fan_out).
    """
    w1, b1, w2, b2, w3, b3 = params
    b1, b2, b3 = (jnp.asarray(b).reshape(1, -1) for b in (b1, b2, b3))

    d_in, d_h = w1.shape
    d_out = w3.shape[1]
    # TODO(synk): on v6e/v7x (256-wide MXU) pad odd 128-multiples (e.g. 384)
    # up to 256 multiples for full MXU column use (gate via pltpu.get_tpu_info()).
    in_p = _round_up(d_in, LANE)
    h_p = _round_up(d_h, LANE)
    out_p = _round_up(d_out, LANE)

    def pad_w(w, rows, cols):
        return jnp.pad(w, ((0, rows - w.shape[0]),
                           (0, cols - w.shape[1]))).astype(jnp.bfloat16)

    def pad_b(b, cols):
        return jnp.pad(b, ((0, 0), (0, cols - b.shape[1]))).astype(jnp.float32)

    tensors = (pad_w(w1, in_p, h_p), pad_b(b1, h_p),
               pad_w(w2, h_p, h_p), pad_b(b2, h_p),
               pad_w(w3, h_p, out_p), pad_b(b3, out_p))
    dims = dict(d_in=d_in, d_out=d_out, in_p=in_p, h_p=h_p, out_p=out_p)
    return tensors, dims


# --------------------------------------------------------------------------
# VMEM budget + batch tiling.
# --------------------------------------------------------------------------
def _vmem_limit_bytes():
    """Scoped VMEM limit: physical capacity minus headroom, capped at 100 MiB."""
    try:
        cap = int(pltpu.get_tpu_info().vmem_capacity_bytes)
    except Exception:
        cap = 64 << 20                        # conservative default: v7x per-TC
    return min(cap - (8 << 20), 100 << 20)    # headroom for compiler scratch


def _pick_batch_tiling(B, in_p, h_p, out_p, out_itemsize, resident_bytes,
                       vmem_budget, tile_m):
    """Choose (tile rows, padded batch, grid length) under the VMEM budget."""

    def step_bytes(tm):
        io = 2 * tm * (in_p * 2 + out_p * out_itemsize)   # double-buffered z/out
        interm = 2 * tm * h_p * 4                          # h1/h2 f32 temporaries
        return resident_bytes + io + interm

    Br = _round_up(B, SUBLANE)
    if tile_m is None:
        # Bigger tiles amortize per-step overhead; v6e's 128 MiB VMEM affords
        # 512-row tiles, v5e/v7x start at 256 and shrink below if needed.
        tile_m = 512 if vmem_budget >= (96 << 20) else 256
    tm = max(min(_round_up(tile_m, SUBLANE), Br), SUBLANE)
    while tm > SUBLANE and step_bytes(tm) > vmem_budget:
        tm = _round_up(tm // 2, SUBLANE)

    # Even out the tiles (minimal pad rows), and keep >= 2 grid steps when the
    # batch allows so dimension_semantics=("parallel",) spans both v7x TCs.
    n_tiles = pl.cdiv(Br, tm)
    if n_tiles == 1 and Br >= 2 * SUBLANE:
        n_tiles = 2
    tm = _round_up(pl.cdiv(Br, n_tiles), SUBLANE)
    grid_m = pl.cdiv(B, tm)
    return tm, tm * grid_m, grid_m


# --------------------------------------------------------------------------
# Forward wrapper.
# --------------------------------------------------------------------------
def generator_forward(z, prepared, *, tile_m=None, out_dtype=jnp.float32):
    """z: (B, input_dim) -> (B, output_dim) in out_dtype.

    `prepared` is the result of prepare_generator_params (pad/cast done once).
    out_dtype=jnp.bfloat16 halves output writeback if the consumer tolerates
    bf16; the default f32 matches the PyTorch module.
    """
    (w1, b1, w2, b2, w3, b3), dims = prepared
    d_in, d_out = dims["d_in"], dims["d_out"]
    in_p, h_p, out_p = dims["in_p"], dims["h_p"], dims["out_p"]

    B, zin = z.shape
    assert zin == d_in, (zin, d_in)

    out_itemsize = jnp.dtype(out_dtype).itemsize
    resident_bytes = sum(int(a.size) * a.dtype.itemsize
                         for a in (w1, b1, w2, b2, w3, b3))   # Buffered(1): 1x
    vmem_limit = _vmem_limit_bytes()
    tm, Bp, grid_m = _pick_batch_tiling(B, in_p, h_p, out_p, out_itemsize,
                                        resident_bytes, vmem_limit, tile_m)

    z_p = jnp.pad(z, ((0, Bp - B), (0, in_p - d_in))).astype(jnp.bfloat16)

    flops = 2 * Bp * (in_p * h_p + h_p * h_p + h_p * out_p)
    transcendentals = Bp * out_p
    bytes_accessed = (z_p.size * z_p.dtype.itemsize + resident_bytes
                      + Bp * out_p * out_itemsize)

    # Weights/biases: constant index_map (VMEM-resident across grid steps) +
    # Buffered(1) — double-buffering a block that never changes wastes VMEM.
    const = lambda i: (0, 0)
    weight_spec = lambda shape: pl.BlockSpec(shape, const,
                                             pipeline_mode=pl.Buffered(1))

    out = pl.pallas_call(
        generator_kernel,
        out_shape=jax.ShapeDtypeStruct((Bp, out_p), out_dtype),
        grid=(grid_m,),
        in_specs=[
            pl.BlockSpec((tm, in_p), lambda i: (i, 0)),   # z tile: pipelined
            weight_spec((in_p, h_p)),
            weight_spec((1, h_p)),
            weight_spec((h_p, h_p)),
            weight_spec((1, h_p)),
            weight_spec((h_p, out_p)),
            weight_spec((1, out_p)),
        ],
        out_specs=pl.BlockSpec((tm, out_p), lambda i: (i, 0)),
        compiler_params=pltpu.CompilerParams(
            dimension_semantics=("parallel",),            # v7x: shard over 2 TCs
            vmem_limit_bytes=int(vmem_limit)),
        cost_estimate=pl.CostEstimate(
            flops=int(flops),
            transcendentals=int(transcendentals),
            bytes_accessed=int(bytes_accessed)),
    )(z_p, w1, b1, w2, b2, w3, b3)

    return out[:B, :d_out]


# --------------------------------------------------------------------------
# Init + reference (reference emulates the kernel's bf16 matmul inputs).
# --------------------------------------------------------------------------
def init_params(key, input_dim, output_dim, hidden_dim):
    """Matches nn.Linear init: U(-1/sqrt(fan_in), 1/sqrt(fan_in))."""
    keys = jax.random.split(key, 6)

    def linear(kw, kb, fan_in, fan_out):
        bound = 1.0 / jnp.sqrt(fan_in)
        w = jax.random.uniform(kw, (fan_in, fan_out), jnp.float32, -bound, bound)
        b = jax.random.uniform(kb, (1, fan_out), jnp.float32, -bound, bound)
        return w, b

    w1, b1 = linear(keys[0], keys[1], input_dim, hidden_dim)
    w2, b2 = linear(keys[2], keys[3], hidden_dim, hidden_dim)
    w3, b3 = linear(keys[4], keys[5], hidden_dim, output_dim)
    return w1, b1, w2, b2, w3, b3


def reference_forward(z, params):
    w1, b1, w2, b2, w3, b3 = params
    bf16 = lambda x: x.astype(jnp.bfloat16)
    h = jnp.dot(bf16(z), bf16(w1), preferred_element_type=jnp.float32) + b1
    h = jnp.maximum(h, 0.0)
    h = jnp.dot(bf16(h), bf16(w2), preferred_element_type=jnp.float32) + b2
    h = jnp.maximum(h, 0.0)
    return jnp.tanh(
        jnp.dot(bf16(h), bf16(w3), preferred_element_type=jnp.float32) + b3)


if __name__ == "__main__":
    key = jax.random.PRNGKey(0)
    k_params, k_z = jax.random.split(key)

    batch, input_dim, hidden_dim, output_dim = 8, 16, 32, 16

    params = init_params(k_params, input_dim, output_dim, hidden_dim)
    prepared = prepare_generator_params(params)   # once, outside the hot path
    z = jax.random.normal(k_z, (batch, input_dim), dtype=jnp.float32)

    out = generator_forward(z, prepared)
    jax.block_until_ready(out)

    ref = reference_forward(z, params)
    assert out.shape == (batch, output_dim)
    assert out.dtype == jnp.float32
    assert jnp.allclose(out, ref, atol=2e-3, rtol=2e-3), (
        float(jnp.max(jnp.abs(out - ref))))

    print("KERNEL_OK")
</pallas_src>

<mosaic_0001>
module attributes {stable_mosaic.version = 11 : i64} {
  func.func @generator_kernel(%arg0: i32, %arg1: memref<8x128xbf16, #tpu.memory_space<vmem>>, %arg2: memref<128x128xbf16, #tpu.memory_space<vmem>>, %arg3: memref<1x128xf32, #tpu.memory_space<vmem>>, %arg4: memref<128x128xbf16, #tpu.memory_space<vmem>>, %arg5: memref<1x128xf32, #tpu.memory_space<vmem>>, %arg6: memref<128x128xbf16, #tpu.memory_space<vmem>>, %arg7: memref<1x128xf32, #tpu.memory_space<vmem>>, %arg8: memref<8x128xf32, #tpu.memory_space<vmem>>) attributes {dimension_semantics = [#tpu.dimension_semantics<parallel>], iteration_bounds = array<i64: 1>, scalar_prefetch = 0 : i64, scratch_operands = 0 : i64, tpu.core_type = #tpu.core_type<tc>, window_params = [{transform_indices = @transform_0, window_bounds = array<i64: 8, 128>}, {pipeline_mode = #tpu.pipeline_mode<synchronous>, transform_indices = @transform_1, window_bounds = array<i64: 128, 128>}, {pipeline_mode = #tpu.pipeline_mode<synchronous>, transform_indices = @transform_2, window_bounds = array<i64: 1, 128>}, {pipeline_mode = #tpu.pipeline_mode<synchronous>, transform_indices = @transform_3, window_bounds = array<i64: 128, 128>}, {pipeline_mode = #tpu.pipeline_mode<synchronous>, transform_indices = @transform_4, window_bounds = array<i64: 1, 128>}, {pipeline_mode = #tpu.pipeline_mode<synchronous>, transform_indices = @transform_5, window_bounds = array<i64: 128, 128>}, {pipeline_mode = #tpu.pipeline_mode<synchronous>, transform_indices = @transform_6, window_bounds = array<i64: 1, 128>}, {transform_indices = @transform_7, window_bounds = array<i64: 8, 128>}]} {
    %c0 = arith.constant 0 : index
    %c0_0 = arith.constant 0 : index
    %0 = vector.load %arg1[%c0, %c0_0] : memref<8x128xbf16, #tpu.memory_space<vmem>>, vector<8x128xbf16>
    %c0_1 = arith.constant 0 : index
    %c0_2 = arith.constant 0 : index
    %1 = vector.load %arg2[%c0_1, %c0_2] : memref<128x128xbf16, #tpu.memory_space<vmem>>, vector<128x128xbf16>
    %cst = arith.constant dense<0.000000e+00> : vector<8x128xf32>
    %2 = tpu.matmul %0, %1, %cst {dimension_numbers = #tpu.dot_dimension_numbers<[1], [0], [0], [1], [0, 0, 1, 1], [], []>} : vector<8x128xbf16>, vector<128x128xbf16>, vector<8x128xf32> -> vector<8x128xf32>
    %c0_3 = arith.constant 0 : index
    %c0_4 = arith.constant 0 : index
    %3 = vector.load %arg3[%c0_3, %c0_4] : memref<1x128xf32, #tpu.memory_space<vmem>>, vector<1x128xf32>
    %4 = vector.broadcast %3 : vector<1x128xf32> to vector<8x128xf32>
    %5 = arith.addf %2, %4 : vector<8x128xf32>
    %cst_5 = arith.constant 0.000000e+00 : f32
    %6 = vector.broadcast %cst_5 : f32 to vector<8x128xf32>
    %7 = arith.maximumf %5, %6 : vector<8x128xf32>
    %8 = arith.truncf %7 : vector<8x128xf32> to vector<8x128xbf16>
    %c0_6 = arith.constant 0 : index
    %c0_7 = arith.constant 0 : index
    %9 = vector.load %arg4[%c0_6, %c0_7] : memref<128x128xbf16, #tpu.memory_space<vmem>>, vector<128x128xbf16>
    %cst_8 = arith.constant dense<0.000000e+00> : vector<8x128xf32>
    %10 = tpu.matmul %8, %9, %cst_8 {dimension_numbers = #tpu.dot_dimension_numbers<[1], [0], [0], [1], [0, 0, 1, 1], [], []>} : vector<8x128xbf16>, vector<128x128xbf16>, vector<8x128xf32> -> vector<8x128xf32>
    %c0_9 = arith.constant 0 : index
    %c0_10 = arith.constant 0 : index
    %11 = vector.load %arg5[%c0_9, %c0_10] : memref<1x128xf32, #tpu.memory_space<vmem>>, vector<1x128xf32>
    %12 = vector.broadcast %11 : vector<1x128xf32> to vector<8x128xf32>
    %13 = arith.addf %10, %12 : vector<8x128xf32>
    %cst_11 = arith.constant 0.000000e+00 : f32
    %14 = vector.broadcast %cst_11 : f32 to vector<8x128xf32>
    %15 = arith.maximumf %13, %14 : vector<8x128xf32>
    %16 = arith.truncf %15 : vector<8x128xf32> to vector<8x128xbf16>
    %c0_12 = arith.constant 0 : index
    %c0_13 = arith.constant 0 : index
    %17 = vector.load %arg6[%c0_12, %c0_13] : memref<128x128xbf16, #tpu.memory_space<vmem>>, vector<128x128xbf16>
    %cst_14 = arith.constant dense<0.000000e+00> : vector<8x128xf32>
    %18 = tpu.matmul %16, %17, %cst_14 {dimension_numbers = #tpu.dot_dimension_numbers<[1], [0], [0], [1], [0, 0, 1, 1], [], []>} : vector<8x128xbf16>, vector<128x128xbf16>, vector<8x128xf32> -> vector<8x128xf32>
    %c0_15 = arith.constant 0 : index
    %c0_16 = arith.constant 0 : index
    %19 = vector.load %arg7[%c0_15, %c0_16] : memref<1x128xf32, #tpu.memory_space<vmem>>, vector<1x128xf32>
    %20 = vector.broadcast %19 : vector<1x128xf32> to vector<8x128xf32>
    %21 = arith.addf %18, %20 : vector<8x128xf32>
    %22 = math.tanh %21 : vector<8x128xf32>
    %c0_17 = arith.constant 0 : index
    %c0_18 = arith.constant 0 : index
    %23 = vector.load %arg8[%c0_17, %c0_18] : memref<8x128xf32, #tpu.memory_space<vmem>>, vector<8x128xf32>
    tpu.vector_store %arg8[%c0_17, %c0_18], %22 {strides = array<i32>} : memref<8x128xf32, #tpu.memory_space<vmem>>, vector<8x128xf32>,
    return
  }
  func.func @transform_0(%arg0: i32) -> (i32, i32) {
    %c0_i32 = arith.constant 0 : i32
    %c0_i32_0 = arith.constant 0 : i32
    return %arg0, %c0_i32 : i32, i32
  }
  func.func @transform_1(%arg0: i32) -> (i32, i32) {
    %c0_i32 = arith.constant 0 : i32
    %c0_i32_0 = arith.constant 0 : i32
    %c0_i32_1 = arith.constant 0 : i32
    return %c0_i32, %c0_i32_0 : i32, i32
  }
  func.func @transform_2(%arg0: i32) -> (i32, i32) {
    %c0_i32 = arith.constant 0 : i32
    %c0_i32_0 = arith.constant 0 : i32
    %c0_i32_1 = arith.constant 0 : i32
    return %c0_i32, %c0_i32_0 : i32, i32
  }
  func.func @transform_3(%arg0: i32) -> (i32, i32) {
    %c0_i32 = arith.constant 0 : i32
    %c0_i32_0 = arith.constant 0 : i32
    %c0_i32_1 = arith.constant 0 : i32
    return %c0_i32, %c0_i32_0 : i32, i32
  }
  func.func @transform_4(%arg0: i32) -> (i32, i32) {
    %c0_i32 = arith.constant 0 : i32
    %c0_i32_0 = arith.constant 0 : i32
    %c0_i32_1 = arith.constant 0 : i32
    return %c0_i32, %c0_i32_0 : i32, i32
  }
  func.func @transform_5(%arg0: i32) -> (i32, i32) {
    %c0_i32 = arith.constant 0 : i32
    %c0_i32_0 = arith.constant 0 : i32
    %c0_i32_1 = arith.constant 0 : i32
    return %c0_i32, %c0_i32_0 : i32, i32
  }
  func.func @transform_6(%arg0: i32) -> (i32, i32) {
    %c0_i32 = arith.constant 0 : i32
    %c0_i32_0 = arith.constant 0 : i32
    %c0_i32_1 = arith.constant 0 : i32
    return %c0_i32, %c0_i32_0 : i32, i32
  }
  func.func @transform_7(%arg0: i32) -> (i32, i32) {
    %c0_i32 = arith.constant 0 : i32
    %c0_i32_0 = arith.constant 0 : i32
    return %arg0, %c0_i32 : i32, i32
  }
}

</mosaic_0001>

<bundles_post_ra>
// kernel: tpu_custom_call.1
= control target key start
LH: loop header
LB: loop body
LE: loop exit
PB: predicated region body
PF: predicated region fallthrough
CT: control target
= control target key end

     0   :  { %12 = vsyncpa [#allocation3], 0  ;;  %s862_s0 = inlined_call_operand.hbm [shape: bf16[8,128], index: 0, kind: input, shape index: {}]   ;;  %s863_s1 = inlined_call_operand.hbm [shape: bf16[128,128], index: 1, kind: input, shape index: {}]   ;;  %s864_s2 = inlined_call_operand.vmem [shape: f32[1,128], index: 2, kind: input, shape index: {}]   ;;  %s865_s3 = inlined_call_operand.hbm [shape: bf16[128,128], index: 3, kind: input, shape index: {}]   ;;  %s866_s4 = inlined_call_operand.vmem [shape: f32[1,128], index: 4, kind: input, shape index: {}]   ;;  %s867_s5 = inlined_call_operand.hbm [shape: bf16[128,128], index: 5, kind: input, shape index: {}]   ;;  %s868_s6 = inlined_call_operand.vmem [shape: f32[1,128], index: 6, kind: input, shape index: {}]   ;;  %s869_s7 = inlined_call_operand.hbm [shape: f32[8,128], index: 7, kind: output, shape index: {}]  }
   0x1   :  { %13 = vsyncpa [#allocation6], 0 }
   0x2   :  { %14 = vsyncpa [#allocation9], 0 }
   0x3   :  { %15 = vsyncpa [#allocation4], 0  ;;  %s705_s24 = smov [#allocation5]   ;;  %s587_s28 = scalar_lea.hbm %s863_s1, 1024 }
   0x4   :  { %s31_s25 = sshll.u32 %s705_s24, 4  ;;  %p588_p0 = scmp.ne.s32.totalorder %s863_s1, %s587_s28  ;;  %s32_s25 = int_to_ptr.vmem [resolvable:$true] %s31_s25 }
   0x5   :  { %p591_p1 = scmp.lt.u32.totalorder %s587_s28, %s863_s1 }
   0x7   :  { %p593_p2 = pnand %p591_p1, %p588_p0 }
   0x9   :  { %596 = shalt.err (!%p593_p2)
}
   0xa   :  { %s597_s10 = scalar_lea.vmem %s32_s25, 1024  ;;  %p602_p4 = scmp.lt.s32.totalorder %s32_s25, %s32_s25 }
   0xb   :  { %p598_p3 = scmp.ne.s32.totalorder %s32_s25, %s597_s10  ;;  %p603_p5 = scmp.lt.s32.totalorder %s597_s10, %s597_s10 }
   0xd   :  { %p604_p6 = por %p603_p5, %p602_p4 }
   0xf   :  { %p605_p7 = pnand %p604_p6, %p598_p3 }
  0x11   :  { %608 = shalt.err (!%p605_p7)
}
  0x12   :  { %s706_s11 = smov 64   ;;  %s707_s12 = smov 4  }
  0x13   :  { %37 = dma.hbm_to_vmem [thread:$0]  %s863_s1, 1024, %s32_s25, [#allocation6], %s706_s11, %s706_s11, %s707_s12  }
  0x14   :  { %s708_s15 = smov [#allocation2]   ;;  %s709_s17 = smov [#allocation7]  }
  0x15   :  { %s22_s16 = sshll.u32 %s708_s15, 4  ;;  %s45_s18 = sshll.u32 %s709_s17, 4  ;;  %s23_s16 = int_to_ptr.vmem [resolvable:$true] %s22_s16  ;;  %s46_s18 = int_to_ptr.vmem [resolvable:$true] %s45_s18 }
  0x16   :  { %s609_s21 = scalar_lea.hbm %s862_s0, 64 }
  0x17   :  { %p610_p8 = scmp.ne.s32.totalorder %s862_s0, %s609_s21  ;;  %p613_p9 = scmp.lt.u32.totalorder %s609_s21, %s862_s0 }
  0x19   :  { %p615_p10 = pnand %p613_p9, %p610_p8 }
  0x1b   :  { %618 = shalt.err (!%p615_p10)
}
  0x1c   :  { %s619_s1 = scalar_lea.vmem %s23_s16, 64  ;;  %p624_p12 = scmp.lt.s32.totalorder %s23_s16, %s23_s16 }
  0x1d   :  { %p620_p11 = scmp.ne.s32.totalorder %s23_s16, %s619_s1  ;;  %p625_p13 = scmp.lt.s32.totalorder %s619_s1, %s619_s1 }
  0x1f   :  { %p626_p0 = por %p625_p13, %p624_p12 }
  0x21   :  { %p627_p1 = pnand %p626_p0, %p620_p11 }
  0x23   :  { %630 = shalt.err (!%p627_p1)
}
  0x24   :  { %25 = dma.hbm_to_vmem [thread:$0]  %s862_s0, 64, %s23_s16, [#allocation3]  }
  0x25   :  { %s631_s30 = scalar_lea.hbm %s865_s3, 1024 }
  0x26   :  { %p632_p2 = scmp.ne.s32.totalorder %s865_s3, %s631_s30  ;;  %p635_p3 = scmp.lt.u32.totalorder %s631_s30, %s865_s3 }
  0x28   :  { %p637_p4 = pnand %p635_p3, %p632_p2 }
  0x2a   :  { %640 = shalt.err (!%p637_p4)
}
  0x2b   :  { %s641_s14 = scalar_lea.vmem %s46_s18, 1024  ;;  %p646_p6 = scmp.lt.s32.totalorder %s46_s18, %s46_s18 }
  0x2c   :  { %p642_p5 = scmp.ne.s32.totalorder %s46_s18, %s641_s14  ;;  %p647_p7 = scmp.lt.s32.totalorder %s641_s14, %s641_s14 }
  0x2e   :  { %p648_p8 = por %p647_p7, %p646_p6 }
  0x30   :  { %p649_p9 = pnand %p648_p8, %p642_p5 }
  0x32   :  { %652 = shalt.err (!%p649_p9)
}
  0x33   :  { %51 = dma.hbm_to_vmem [thread:$0]  %s865_s3, 1024, %s46_s18, [#allocation6], %s706_s11, %s706_s11, %s707_s12  }
  0x34   :  { %s710_s16 = smov [#allocation8]   ;;  %s653_s21 = scalar_lea.hbm %s867_s5, 1024 }
  0x35   :  { %s59_s17 = sshll.u32 %s710_s16, 4  ;;  %p654_p10 = scmp.ne.s32.totalorder %s867_s5, %s653_s21  ;;  %s60_s17 = int_to_ptr.vmem [resolvable:$true] %s59_s17 }
  0x36   :  { %p657_p11 = scmp.lt.u32.totalorder %s653_s21, %s867_s5 }
  0x38   :  { %p659_p12 = pnand %p657_p11, %p654_p10 }
  0x3a   :  { %662 = shalt.err (!%p659_p12)
}
  0x3b   :  { %s663_s1 = scalar_lea.vmem %s60_s17, 1024  ;;  %p668_p0 = scmp.lt.s32.totalorder %s60_s17, %s60_s17 }
  0x3c   :  { %p664_p13 = scmp.ne.s32.totalorder %s60_s17, %s663_s1  ;;  %p669_p1 = scmp.lt.s32.totalorder %s663_s1, %s663_s1 }
  0x3e   :  { %p670_p2 = por %p669_p1, %p668_p0 }
  0x40   :  { %p671_p3 = pnand %p670_p2, %p664_p13 }
  0x42   :  { %674 = shalt.err (!%p671_p3)
}
  0x43   :  { %65 = dma.hbm_to_vmem [thread:$0]  %s867_s5, 1024, %s60_s17, [#allocation9], %s706_s11, %s706_s11, %s707_s12  }
  0x44   :  { %697 = dma.done.wait [#allocation3], 64  }
  0x45   :  { %698 = vsyncadd [#allocation3], 4294967232 }
  0x46   :  { %699 = dma.done.wait [#allocation6], 2048  }
  0x47   :  { %700 = vsyncadd [#allocation6], 4294965248 }
  0x48   :  { %701 = dma.done.wait [#allocation9], 1024  }
  0x49   :  { %702 = vsyncadd [#allocation9], 4294966272  ;;  %v711_v0 = vmov 0.0   ;;  %vm712_vm0 = vmmov 0   ;;  %v561_v1 = vld [vmem:[#allocation5] sm:$0xff]   ;;  %v562_v2 = vld [vmem:[#allocation5 + $0x8] sm:$0xff]  }
  0x4a   :  { %492 = vmatprep.subr.bf16.mxu0 %v711_v0  ;;  %508 = vmatprep.mubr.msk.bf16.mxu0 %vm712_vm0, %v711_v0  ;;  %v563_v3 = vld [vmem:[#allocation5 + $0x10] sm:$0xff]   ;;  %v569_v4 = vld [vmem:[#allocation7] sm:$0xff]   ;;  %v564_v5 = vld [vmem:[#allocation5 + $0x18] sm:$0xff]   ;;  %s713_s28 = smov [#allocation10]  }
  0x4b   :  { %512 = vmatprep.subr.bf16.mxu1 %v711_v0  ;;  %528 = vmatprep.mubr.msk.bf16.mxu1 %vm712_vm0, %v711_v0  ;;  %v570_v6 = vld [vmem:[#allocation7 + $0x8] sm:$0xff]   ;;  %v565_v7 = vld [vmem:[#allocation5 + $0x20] sm:$0xff]   ;;  %v571_v8 = vld [vmem:[#allocation7 + $0x10] sm:$0xff]  }
  0x4c   :  { %493 = vmatpush3.bf16.msra.mxu0 %v561_v1  ;;  %513 = vmatpush3.bf16.msra.mxu1 %v569_v4  ;;  %v566_v9 = vld [vmem:[#allocation5 + $0x28] sm:$0xff]   ;;  %v572_v10 = vld [vmem:[#allocation7 + $0x18] sm:$0xff]   ;;  %v567_v11 = vld [vmem:[#allocation5 + $0x30] sm:$0xff]  }
  0x4d   :  { %494 = vmatprep.subr.bf16.mxu0 %v711_v0  ;;  %514 = vmatprep.subr.bf16.mxu1 %v711_v0  ;;  %v573_v12 = vld [vmem:[#allocation7 + $0x20] sm:$0xff]   ;;  %v568_v13 = vld [vmem:[#allocation5 + $0x38] sm:$0xff]   ;;  %v574_v14 = vld [vmem:[#allocation7 + $0x28] sm:$0xff]  }
  0x4e   :  { %v81_v15 = vld [vmem:[#allocation2] sm:$0xf]  ;;  %v575_v16 = vld [vmem:[#allocation7 + $0x30] sm:$0xff]   ;;  %v577_v18 = vld [vmem:[#allocation8] sm:$0xff]  }
  0x4f   :  { %v576_v17 = vld [vmem:[#allocation7 + $0x38] sm:$0xff]   ;;  %v578_v19 = vld [vmem:[#allocation8 + $0x8] sm:$0xff]   ;;  %v579_v20 = vld [vmem:[#allocation8 + $0x10] sm:$0xff]  }
  0x50   :  { %495 = vmatpush3.bf16.msra.mxu0 %v562_v2  ;;  %515 = vmatpush3.bf16.msra.mxu1 %v570_v6  ;;  %v580_v21 = vld [vmem:[#allocation8 + $0x18] sm:$0xff]   ;;  %v581_v22 = vld [vmem:[#allocation8 + $0x20] sm:$0xff]   ;;  %v582_v23 = vld [vmem:[#allocation8 + $0x28] sm:$0xff]  }
  0x51   :  { %496 = vmatprep.subr.bf16.mxu0 %v711_v0  ;;  %516 = vmatprep.subr.bf16.mxu1 %v711_v0  ;;  %v438_v24 = vld [vmem:[%s864_s2] ss:$0 sm:$0xff]  ;;  %v583_v32 = vld [vmem:[#allocation8 + $0x30] sm:$0xff]  }
  0x52   :  { %v584_v33 = vld [vmem:[#allocation8 + $0x38] sm:$0xff]  }
  0x53   :  { %v447_v34 = vld [vmem:[%s866_s4] ss:$0 sm:$0xff]  ;;  %s427_s4 = sshll.u32 %s713_s28, 4  ;;  %s428_s4 = int_to_ptr.vmem [resolvable:$true] %s427_s4 }
  0x54   :  { %497 = vmatpush3.bf16.msra.mxu0 %v563_v3  ;;  %517 = vmatpush3.bf16.msra.mxu1 %v571_v8  ;;  %v456_v42 = vld [vmem:[%s868_s6] ss:$0 sm:$0xff]  ;;  %s675_s29 = scalar_lea.vmem %s428_s4, 128  ;;  %p680_p5 = scmp.lt.s32.totalorder %s428_s4, %s428_s4 }
  0x55   :  { %498 = vmatprep.subr.bf16.mxu0 %v711_v0  ;;  %518 = vmatprep.subr.bf16.mxu1 %v711_v0  ;;  %p676_p4 = scmp.ne.s32.totalorder %s428_s4, %s675_s29  ;;  %p681_p6 = scmp.lt.s32.totalorder %s675_s29, %s675_s29 }
  0x57   :  { %p682_p7 = por %p681_p6, %p680_p5 }
  0x58   :  { %499 = vmatpush3.bf16.msra.mxu0 %v564_v5  ;;  %519 = vmatpush3.bf16.msra.mxu1 %v572_v10 }
  0x59   :  { %500 = vmatprep.subr.bf16.mxu0 %v711_v0  ;;  %520 = vmatprep.subr.bf16.mxu1 %v711_v0  ;;  %p683_p8 = pnand %p682_p7, %p676_p4 }
  0x5c   :  { %501 = vmatpush3.bf16.msra.mxu0 %v565_v7  ;;  %521 = vmatpush3.bf16.msra.mxu1 %v573_v12 }
  0x5d   :  { %502 = vmatprep.subr.bf16.mxu0 %v711_v0  ;;  %522 = vmatprep.subr.bf16.mxu1 %v711_v0 }
  0x60   :  { %503 = vmatpush3.bf16.msra.mxu0 %v566_v9  ;;  %523 = vmatpush3.bf16.msra.mxu1 %v574_v14 }
  0x61   :  { %504 = vmatprep.subr.bf16.mxu0 %v711_v0  ;;  %524 = vmatprep.subr.bf16.mxu1 %v711_v0 }
  0x64   :  { %505 = vmatpush3.bf16.msra.mxu0 %v567_v11  ;;  %525 = vmatpush3.bf16.msra.mxu1 %v575_v16 }
  0x65   :  { %506 = vmatprep.subr.bf16.mxu0 %v711_v0  ;;  %526 = vmatprep.subr.bf16.mxu1 %v711_v0 }
  0x68   :  { %507 = vmatpush3.bf16.msra.mxu0 %v568_v13  ;;  %527 = vmatpush3.bf16.msra.mxu1 %v576_v17 }
  0x69   :  { %532 = vmatprep.subr.bf16.mxu0 %v711_v0 }
  0x6b   :  { %509 = vmatmul.mubr.bf16.vlgmr.msra.gmra.mrb[0].mxu0 %v81_v15 }
  0x6c   :  { %548 = vmatprep.mubr.msk.bf16.mxu0 %vm712_vm0, %v711_v0  ;;  %533 = vmatpush3.bf16.msra.mxu0 %v577_v18 }
  0x6d   :  { %534 = vmatprep.subr.bf16.mxu0 %v711_v0 }
  0x70   :  { %535 = vmatpush3.bf16.msra.mxu0 %v578_v19 }
  0x71   :  { %536 = vmatprep.subr.bf16.mxu0 %v711_v0 }
  0x74   :  { %537 = vmatpush3.bf16.msra.mxu0 %v579_v20 }
  0x75   :  { %538 = vmatprep.subr.bf16.mxu0 %v711_v0 }
  0x78   :  { %539 = vmatpush3.bf16.msra.mxu0 %v580_v21 }
  0x79   :  { %540 = vmatprep.subr.bf16.mxu0 %v711_v0 }
  0x7c   :  { %541 = vmatpush3.bf16.msra.mxu0 %v581_v22 }
  0x7d   :  { %542 = vmatprep.subr.bf16.mxu0 %v711_v0 }
  0x80   :  { %543 = vmatpush3.bf16.msra.mxu0 %v582_v23 }
  0x81   :  { %544 = vmatprep.subr.bf16.mxu0 %v711_v0 }
  0x84   :  { %545 = vmatpush3.bf16.msra.mxu0 %v583_v32 }
  0x85   :  { %546 = vmatprep.subr.bf16.mxu0 %v711_v0 }
  0x88   :  { %547 = vmatpush3.bf16.msra.mxu0 %v584_v33 }
 0x13e   :  { %v187_v25 = vpop.f32.mrb[0].mxu0 }
 0x13f   :  { %v188_v26 = vadd.f32 %v438_v24, %v187_v25  ;;  %v510_v27 = vpop.f32.mrb[1].mxu0 }
 0x140   :  { %v190_v28 = vpop.f32.mrb[2].mxu0 }
 0x141   :  { %v193_v29 = vmax.f32 %v188_v26, 0.0  ;;  %v511_v30 = vpop.f32.mrb[3].mxu0 }
 0x143   :  { %v194_v31 = vpack.c.bf16 %v193_v29, %v193_v29 }
 0x145   :  { %529 = vmatmul.mubr.bf16.vlgmr.msra.gmra.mrb[0].mxu1 %v194_v31 }
 0x218   :  { %v300_v35 = vpop.f32.mrb[0].mxu1 }
 0x219   :  { %v301_v36 = vadd.f32 %v447_v34, %v300_v35  ;;  %v530_v37 = vpop.f32.mrb[1].mxu1 }
 0x21a   :  { %v303_v38 = vpop.f32.mrb[2].mxu1 }
 0x21b   :  { %v306_v39 = vmax.f32 %v301_v36, 0.0  ;;  %v531_v40 = vpop.f32.mrb[3].mxu1 }
 0x21d   :  { %v307_v41 = vpack.c.bf16 %v306_v39, %v306_v39 }
 0x21f   :  { %549 = vmatmul.mubr.bf16.vlgmr.msra.gmra.mrb[4].mxu0 %v307_v41 }
 0x2f2   :  { %v413_v43 = vpop.f32.mrb[4].mxu0 }
 0x2f3   :  { %v414_v44 = vadd.f32 %v456_v42, %v413_v43  ;;  %v550_v45 = vpop.f32.mrb[5].mxu0 }
 0x2f4   :  { %v416_v46 = vpop.f32.mrb[6].mxu0 }
 0x2f5   :  { %585 = vtanh.f32 %v414_v44  ;;  %v551_v47 = vpop.f32.mrb[7].mxu0 }
 0x2ff   :  { %v586_v48 = vpop.eup %585 }
 0x300   :  { %420 = vst [vmem:[#allocation10] sm:$0xff] %v586_v48 }
 0x301   :  { %686 = shalt.err (!%p683_p8)
}
 0x302   :  { %s687_s8 = scalar_lea.hbm %s869_s7, 128 }
 0x303   :  { %p688_p9 = scmp.ne.s32.totalorder %s869_s7, %s687_s8  ;;  %p691_p10 = scmp.lt.u32.totalorder %s687_s8, %s869_s7 }
 0x305   :  { %p693_p11 = pnand %p691_p10, %p688_p9 }
 0x307   :  { %696 = shalt.err (!%p693_p11)
}
 0x308   :  { %430 = dma.vmem_to_hbm [thread:$0]  %s428_s4, 128, %s869_s7, [#allocation4]  }
 0x309   :  { %703 = dma.done.wait [#allocation4], 128  }
 0x30a   :  { %704 = vsyncadd [#allocation4], 4294967168 }
 0x30b   :  { %434 = vsyncpa [#allocation3], 1 }
 0x30c   :  { %435 = vsyncpa [#allocation6], 1 }
 0x30d   :  { %436 = vsyncpa [#allocation9], 1 }
 0x30e   :  { %437 = vsyncpa [#allocation4], 1 }

</bundles_post_ra>
